<compile_context>
chip_gen: v5e
topology: v5e:2x2
jax: 0.10.0
libtpu: 0.0.40
codegen_flags: <defaults>
</compile_context>

<pallas_src>
import functools

import numpy as np
import jax
import jax.numpy as jnp
from jax.experimental import pallas as pl
from jax.experimental.pallas import tpu as pltpu

_BLOCK_BYTES = 1 << 20            # ~1 MiB of int8 per input block (x2 buffers)
_VMEM_LIMIT = 32 * 1024 * 1024    # safe on v5e (raises 16MiB default) / v6e / v7x


def _all_last_kernel(x_ref, o_ref, acc_ref, *, k_total, tk, need_mask):
    """dim == last: reduce the lane axis of an int8 (bm, tk) block."""
    k = pl.program_id(1)

    @pl.when(k == 0)
    def _init():
        acc_ref[...] = jnp.ones_like(acc_ref)

    nz = x_ref[...] != 0                                    # (bm, tk) bool
    if need_mask:                                           # partial tail K block
        col = jax.lax.broadcasted_iota(jnp.int32, nz.shape, 1) + k * tk
        nz = nz | (col >= k_total)
    ind = nz.astype(jnp.int32)
    acc_ref[...] = jnp.minimum(acc_ref[...], jnp.min(ind, axis=1, keepdims=True))

    @pl.when(k == pl.num_programs(1) - 1)
    def _fin():
        o_ref[...] = acc_ref[...].astype(jnp.int8)


def _all_mid_kernel(x_ref, o_ref, acc_ref, *, k_total, tk, need_mask):
    """dim != last: reduce the sublane (K) axis of an int8 (bpre, tk, tpost) block."""
    k = pl.program_id(2)

    @pl.when(k == 0)
    def _init():
        acc_ref[...] = jnp.ones_like(acc_ref)

    nz = x_ref[...] != 0                                    # (bpre, tk, tpost) bool
    if need_mask:                                           # partial tail K block
        row = jax.lax.broadcasted_iota(jnp.int32, nz.shape, 1) + k * tk
        nz = nz | (row >= k_total)
    ind = nz.astype(jnp.int32)
    acc_ref[...] = jnp.minimum(acc_ref[...], jnp.min(ind, axis=1, keepdims=True))

    @pl.when(k == pl.num_programs(2) - 1)
    def _fin():
        o_ref[...] = acc_ref[...].astype(jnp.int8)


def _round_down(x, m):
    return max(m, (x // m) * m)


def pallas_all(x, dim, keepdim):
    """Semantics of torch.all(x, dim=dim[, keepdim=keepdim]) -> bool tensor."""
    ndim = x.ndim
    dim = dim % ndim

    shape = x.shape
    pre = int(np.prod(shape[:dim]))
    K = int(shape[dim])
    post = int(np.prod(shape[dim + 1:]))
    out_shape_nokeep = shape[:dim] + shape[dim + 1:]

    # Empty reduction (torch.all over an empty dim is True) or empty output.
    if K == 0 or pre * post == 0:
        res = jnp.ones(out_shape_nokeep, dtype=jnp.bool_)
        if keepdim:
            res = jnp.expand_dims(res, dim)
        return res

    # int8 indicators: 1 byte/elem through the kernel; compare is done on-chip.
    if x.dtype == jnp.bool_:
        xi = x.astype(jnp.int8)
    elif x.dtype in (jnp.int8, jnp.uint8):
        xi = jax.lax.bitcast_convert_type(x, jnp.int8)
    else:
        xi = (x != 0).astype(jnp.int8)

    if post == 1:
        # ---- reduced dim is already last: (M, K), reduce along lanes ----
        M = pre
        x2 = xi.reshape(M, K)                         # pure reshape, no transpose
        tk = K if K <= 8192 else 8192                 # lanes: full K or mult of 128
        bm = max(32, min(1024, _BLOCK_BYTES // max(tk, 1)))
        bm = M if bm >= M else _round_down(bm, 32)    # sublanes: full M or mult of 32
        grid = (pl.cdiv(M, bm), pl.cdiv(K, tk))
        kernel = functools.partial(_all_last_kernel, k_total=K, tk=tk,
                                   need_mask=(K % tk != 0))
        out = pl.pallas_call(
            kernel,
            out_shape=jax.ShapeDtypeStruct((M, 1), jnp.int8),
            grid_spec=pltpu.PrefetchScalarGridSpec(
                num_scalar_prefetch=0,
                grid=grid,
                in_specs=[pl.BlockSpec((bm, tk), lambda i, k: (i, k))],
                out_specs=pl.BlockSpec((bm, 1), lambda i, k: (i, 0)),
                scratch_shapes=[pltpu.VMEM((bm, 1), jnp.int32)],
            ),
            compiler_params=pltpu.CompilerParams(
                dimension_semantics=("parallel", "arbitrary"),
                vmem_limit_bytes=_VMEM_LIMIT),
        )(x2)
        res = out.reshape(out_shape_nokeep)
    else:
        # ---- keep memory order: (pre, K, post); post on lanes, reduce K ----
        x3 = xi.reshape(pre, K, post)                 # pure reshape, no transpose
        tpost = post if post <= 2048 else 2048        # lanes: full post or mult of 128
        tk_budget = max(1, _BLOCK_BYTES // tpost)
        tk = K if K <= tk_budget else _round_down(tk_budget, 32)
        bpre = max(1, min(pre, _BLOCK_BYTES // (tk * tpost)))
        grid = (pl.cdiv(pre, bpre), pl.cdiv(post, tpost), pl.cdiv(K, tk))
        kernel = functools.partial(_all_mid_kernel, k_total=K, tk=tk,
                                   need_mask=(K % tk != 0))
        out = pl.pallas_call(
            kernel,
            out_shape=jax.ShapeDtypeStruct((pre, 1, post), jnp.int8),
            grid_spec=pltpu.PrefetchScalarGridSpec(
                num_scalar_prefetch=0,
                grid=grid,
                in_specs=[pl.BlockSpec((bpre, tk, tpost),
                                       lambda p, j, k: (p, k, j))],
                out_specs=pl.BlockSpec((bpre, 1, tpost),
                                       lambda p, j, k: (p, 0, j)),
                scratch_shapes=[pltpu.VMEM((bpre, 1, tpost), jnp.int32)],
            ),
            compiler_params=pltpu.CompilerParams(
                dimension_semantics=("parallel", "parallel", "arbitrary"),
                vmem_limit_bytes=_VMEM_LIMIT),
        )(x3)
        res = out.reshape(out_shape_nokeep)

    res = res.astype(jnp.bool_)
    if keepdim:   # keepdim None/False -> reduced dim dropped (torch default)
        res = jnp.expand_dims(res, dim)
    return res


if __name__ == "__main__":
    key = jax.random.PRNGKey(0)
    x = jax.random.randint(key, (2, 4, 16, 16), 0, 2,
                           dtype=jnp.int32).astype(jnp.bool_)

    # dim not last (no-transpose 3-D path), torch default keepdim=False
    out = jax.block_until_ready(pallas_all(x, 1, False))
    ref = jnp.all(x, axis=1)
    assert out.shape == ref.shape and bool(jnp.all(out == ref))

    # dim == last (lane-reduce path), keepdim=True
    out2 = jax.block_until_ready(pallas_all(x, -1, True))
    ref2 = jnp.all(x, axis=-1, keepdims=True)
    assert out2.shape == ref2.shape and bool(jnp.all(out2 == ref2))

    # keepdim=None (module's default branch)
    out3 = jax.block_until_ready(pallas_all(x, 2, None))
    ref3 = jnp.all(x, axis=2)
    assert out3.shape == ref3.shape and bool(jnp.all(out3 == ref3))

    # dim=0 (pre == 1 path)
    out4 = jax.block_until_ready(pallas_all(x, 0, False))
    ref4 = jnp.all(x, axis=0)
    assert out4.shape == ref4.shape and bool(jnp.all(out4 == ref4))

    print("KERNEL_OK")
</pallas_src>

<mosaic_0001>
module attributes {stable_mosaic.version = 11 : i64} {
  func.func @_all_mid_kernel(%arg0: i32, %arg1: i32, %arg2: i32, %arg3: memref<2x4x256xi8, #tpu.memory_space<vmem>>, %arg4: memref<2x1x256xi8, #tpu.memory_space<vmem>>, %arg5: memref<2x1x256xi32, #tpu.memory_space<vmem>>) attributes {dimension_semantics = [#tpu.dimension_semantics<parallel>, #tpu.dimension_semantics<parallel>, #tpu.dimension_semantics<arbitrary>], iteration_bounds = array<i64: 1, 1, 1>, scalar_prefetch = 0 : i64, scratch_operands = 1 : i64, tpu.core_type = #tpu.core_type<tc>, window_params = [{transform_indices = @transform_0, window_bounds = array<i64: 2, 4, 256>}, {transform_indices = @transform_1, window_bounds = array<i64: 2, 1, 256>}]} {
    %c0_i32 = arith.constant 0 : i32
    %0 = arith.cmpi eq, %arg2, %c0_i32 : i32
    %1 = arith.extui %0 : i1 to i32
    %c0_i32_0 = arith.constant 0 : i32
    %2 = arith.cmpi ne, %1, %c0_i32_0 : i32
    scf.if %2 {
      %c1_i32 = arith.constant 1 : i32
      %15 = vector.broadcast %c1_i32 : i32 to vector<2x1x256xi32>
      %c0_11 = arith.constant 0 : index
      %c0_12 = arith.constant 0 : index
      %c0_13 = arith.constant 0 : index
      %16 = vector.load %arg5[%c0_11, %c0_12, %c0_13] : memref<2x1x256xi32, #tpu.memory_space<vmem>>, vector<2x1x256xi32>
      tpu.vector_store %arg5[%c0_11, %c0_12, %c0_13], %15 {strides = array<i32>} : memref<2x1x256xi32, #tpu.memory_space<vmem>>, vector<2x1x256xi32>,
    } else {
    }
    %c0 = arith.constant 0 : index
    %c0_1 = arith.constant 0 : index
    %c0_2 = arith.constant 0 : index
    %3 = vector.load %arg3[%c0, %c0_1, %c0_2] : memref<2x4x256xi8, #tpu.memory_space<vmem>>, vector<2x4x256xi8>
    %c0_i8 = arith.constant 0 : i8
    %4 = vector.broadcast %c0_i8 : i8 to vector<2x4x256xi8>
    %5 = arith.cmpi ne, %3, %4 : vector<2x4x256xi8>
    %6 = arith.extui %5 : vector<2x4x256xi1> to vector<2x4x256xi32>
    %c0_3 = arith.constant 0 : index
    %c0_4 = arith.constant 0 : index
    %c0_5 = arith.constant 0 : index
    %7 = vector.load %arg5[%c0_3, %c0_4, %c0_5] : memref<2x1x256xi32, #tpu.memory_space<vmem>>, vector<2x1x256xi32>
    %cst = arith.constant dense<2147483647> : vector<2x256xi32>
    %8 = vector.multi_reduction <minsi>, %6, %cst [1] : vector<2x4x256xi32> to vector<2x256xi32>
    %9 = vector.shape_cast %8 : vector<2x256xi32> to vector<2x1x256xi32>
    %10 = arith.minsi %7, %9 : vector<2x1x256xi32>
    %c0_6 = arith.constant 0 : index
    %c0_7 = arith.constant 0 : index
    %c0_8 = arith.constant 0 : index
    %11 = vector.load %arg5[%c0_6, %c0_7, %c0_8] : memref<2x1x256xi32, #tpu.memory_space<vmem>>, vector<2x1x256xi32>
    tpu.vector_store %arg5[%c0_6, %c0_7, %c0_8], %10 {strides = array<i32>} : memref<2x1x256xi32, #tpu.memory_space<vmem>>, vector<2x1x256xi32>,
    %c0_i32_9 = arith.constant 0 : i32
    %12 = arith.cmpi eq, %arg2, %c0_i32_9 : i32
    %13 = arith.extui %12 : i1 to i32
    %c0_i32_10 = arith.constant 0 : i32
    %14 = arith.cmpi ne, %13, %c0_i32_10 : i32
    scf.if %14 {
      %c0_11 = arith.constant 0 : index
      %c0_12 = arith.constant 0 : index
      %c0_13 = arith.constant 0 : index
      %15 = vector.load %arg5[%c0_11, %c0_12, %c0_13] : memref<2x1x256xi32, #tpu.memory_space<vmem>>, vector<2x1x256xi32>
      %16 = arith.trunci %15 : vector<2x1x256xi32> to vector<2x1x256xi8>
      %c0_14 = arith.constant 0 : index
      %c0_15 = arith.constant 0 : index
      %c0_16 = arith.constant 0 : index
      %17 = vector.load %arg4[%c0_14, %c0_15, %c0_16] : memref<2x1x256xi8, #tpu.memory_space<vmem>>, vector<2x1x256xi8>
      tpu.vector_store %arg4[%c0_14, %c0_15, %c0_16], %16 {strides = array<i32>} : memref<2x1x256xi8, #tpu.memory_space<vmem>>, vector<2x1x256xi8>,
    } else {
    }
    return
  }
  func.func @transform_0(%arg0: i32, %arg1: i32, %arg2: i32) -> (i32, i32, i32) {
    %c0_i32 = arith.constant 0 : i32
    return %arg0, %arg2, %arg1 : i32, i32, i32
  }
  func.func @transform_1(%arg0: i32, %arg1: i32, %arg2: i32) -> (i32, i32, i32) {
    %c0_i32 = arith.constant 0 : i32
    %c0_i32_0 = arith.constant 0 : i32
    return %arg0, %c0_i32, %arg1 : i32, i32, i32
  }
}

</mosaic_0001>

<bundles_post_ra>
// kernel: tpu_custom_call.1
= control target key start
LH: loop header
LB: loop body
LE: loop exit
PB: predicated region body
PF: predicated region fallthrough
CT: control target
= control target key end

     0   :  { %6 = vsyncpa [#allocation4], 0  ;;  %s197_s9 = smov [#allocation3]   ;;  %s198_s11 = smov 32   ;;  %s260_s0 = inlined_call_operand.hbm [shape: s8[2,4,256], index: 0, kind: input, shape index: {}]   ;;  %s261_s1 = inlined_call_operand.vmem [shape: s8[2,1,256], index: 1, kind: output, shape index: {}]  }
   0x1   :  { %s11_s8 = sshll.u32 %s260_s0, 4  ;;  %s13_s10 = sshll.u32 %s197_s9, 4  ;;  %s12_s8 = int_to_ptr.hbm [resolvable:$true] %s11_s8  ;;  %s14_s10 = int_to_ptr.vmem [resolvable:$true] %s13_s10 }
   0x2   :  { %s199_s12 = smov 2  }
   0x3   :  { %19 = dma.hbm_to_vmem [thread:$0]  %s12_s8, 64, %s14_s10, [#allocation4], %s198_s11, %s198_s11, %s199_s12  }
   0x4   :  { %195 = dma.done.wait [#allocation4], 64  }
   0x5   :  { %196 = vsyncadd [#allocation4], 4294967232  ;;  %v30_v0 = vlaneseq  ;;  %v200_v2 = vmov 1   ;;  %v36_v3 = vld [vmem:[#allocation3] sm:$0x3]  ;;  %v201_v5 = vmov 0  }
   0x6   :  { %v37_v4 = vld [vmem:[#allocation3 + $0x2] sm:$0x3]  ;;  %vm38_vm1 = vnez %v36_v3  ;;  %vm65_vm5 = vcmask 1043456  }
   0x7   :  { %vm215_vm0 = vcmp.lt.s32.totalorder %v30_v0, 256  ;;  %vm39_vm2 = vnez %v37_v4  ;;  %v40_v6 = vsel %vm38_vm1, 16843009, %v201_v5 }
   0x8   :  { %34 = vst.msk [vmem:[#allocation2] sm:$0x3] %vm215_vm0, %v200_v2  ;;  %v41_v7 = vsel %vm39_vm2, 16843009, %v201_v5  ;;  %v42_v8 = vunpack.c.0.s8 %v40_v6 }
   0x9   :  { %35 = vst.msk [vmem:[#allocation2 + $0x2] sm:$0x3] %vm215_vm0, %v200_v2  ;;  %v43_v9 = vunpack.c.0.s8 %v41_v7  ;;  %v155_v7 = vld [vmem:[%s261_s1] sm:$0x3] }
   0xa   :  { %vm44_vm3 = vcmp.ne.s32.totalorder %v42_v8, 0 }
   0xb   :  { %vm45_vm4 = vcmp.ne.s32.totalorder %v43_v9, 0  ;;  %v46_v10 = vsel %vm44_vm3, 1, %v201_v5 }
   0xc   :  { %v47_v11 = vsel %vm45_vm4, 1, %v201_v5  ;;  %48 = vst [vmem:[#allocation1] ss:$2 sm:$0xff] %v46_v10 }
   0xd   :  { %52 = vst [vmem:[#allocation1 + $0x10] ss:$2 sm:$0xff] %v47_v11 }
   0xf   :  { %v63_v45 = vld [vmem:[#allocation2] sm:$0x3] }
  0x10   :  { %v64_v50 = vld [vmem:[#allocation2 + $0x2] sm:$0x3] }
  0x13   :  { %v49_v12 = vld.sshfl [vmem:[#allocation1] sm:$0xff pattern:$0x75316420]  ;;  %v50_v13 = vld.sshfl [vmem:[#allocation1 + $0x8] sm:$0xff pattern:$0x75316420] }
  0x14   :  { %vm55_vm6 = vcmp.ne.s32.totalorder %v49_v12, 0  ;;  %vm56_vm7 = vcmp.ne.s32.totalorder %v50_v13, 0  ;;  %v53_v14 = vld.sshfl [vmem:[#allocation1 + $0x10] sm:$0xff pattern:$0x75316420] }
  0x15   :  { %v59_v15 = vsel %vm55_vm6, 1, %v201_v5  ;;  %v60_v16 = vsel %vm56_vm7, 1, %v201_v5  ;;  %v54_v17 = vld.sshfl [vmem:[#allocation1 + $0x18] sm:$0xff pattern:$0x75316420]  ;;  %vm57_vm8 = vcmp.ne.s32.totalorder %v53_v14, 0 }
  0x16   :  { %v66_v18 = vsel %vm65_vm5, %v59_v15, 2147483647  ;;  %v76_v19 = vsel %vm65_vm5, %v60_v16, 2147483647  ;;  %vm58_vm9 = vcmp.ne.s32.totalorder %v54_v17, 0  ;;  %v61_v20 = vsel %vm57_vm8, 1, %v201_v5 }
  0x17   :  { %v67_v21 = vrot.slane %v66_v18, 4  ;;  %v77_v22 = vrot.slane %v76_v19, 4  ;;  %v62_v23 = vsel %vm58_vm9, 1, %v201_v5  ;;  %v86_v24 = vsel %vm65_vm5, %v61_v20, 2147483647 }
  0x18   :  { %v87_v25 = vrot.slane %v86_v24, 4  ;;  %v96_v26 = vsel %vm65_vm5, %v62_v23, 2147483647  ;;  %vm108_vm5 = vcmask 1040384   ;;  %v158_v12 = vld [vmem:[%s261_s1 + $0x2] sm:$0x3] }
  0x19   :  { %vm68_vm10 = vcmp.lt.s32.totalorder %v66_v18, %v67_v21  ;;  %vm78_vm11 = vcmp.lt.s32.totalorder %v76_v19, %v77_v22  ;;  %v97_v27 = vrot.slane %v96_v26, 4 }
  0x1a   :  { %v69_v28 = vsel %vm68_vm10, %v66_v18, %v67_v21  ;;  %v79_v29 = vsel %vm78_vm11, %v76_v19, %v77_v22  ;;  %vm88_vm12 = vcmp.lt.s32.totalorder %v86_v24, %v87_v25  ;;  %vm149_vm10 = vsmask.f32 0 }
  0x1b   :  { %v70_v30 = vrot.slane %v69_v28, 2  ;;  %v80_v31 = vrot.slane %v79_v29, 2  ;;  %v89_v32 = vsel %vm88_vm12, %v86_v24, %v87_v25  ;;  %vm98_vm13 = vcmp.lt.s32.totalorder %v96_v26, %v97_v27 }
  0x1c   :  { %v90_v33 = vrot.slane %v89_v32, 2  ;;  %v99_v34 = vsel %vm98_vm13, %v96_v26, %v97_v27  ;;  %vm151_vm11 = vcmask 1041409   ;;  %vm152_vm12 = vsmask.f32 1024  ;;  %vm234_vm13 = vmand %vm108_vm5, %vm149_vm10 }
  0x1d   :  { %vm71_vm14 = vcmp.lt.s32.totalorder %v69_v28, %v70_v30  ;;  %vm81_vm15 = vcmp.lt.s32.totalorder %v79_v29, %v80_v31  ;;  %v100_v35 = vrot.slane %v99_v34, 2 }
  0x1e   :  { %v72_v36 = vsel %vm71_vm14, %v69_v28, %v70_v30  ;;  %v82_v37 = vsel %vm81_vm15, %v79_v29, %v80_v31  ;;  %vm91_vm1 = vcmp.lt.s32.totalorder %v89_v32, %v90_v33  ;;  %vm238_vm14 = vmand %vm151_vm11, %vm152_vm12 }
  0x1f   :  { %v73_v38 = vrot.slane %v72_v36, 1  ;;  %v83_v39 = vrot.slane %v82_v37, 1  ;;  %v92_v40 = vsel %vm91_vm1, %v89_v32, %v90_v33  ;;  %vm101_vm2 = vcmp.lt.s32.totalorder %v99_v34, %v100_v35 }
  0x20   :  { %v93_v41 = vrot.slane %v92_v40, 1  ;;  %v102_v42 = vsel %vm101_vm2, %v99_v34, %v100_v35 }
  0x21   :  { %vm74_vm3 = vcmp.lt.s32.totalorder %v72_v36, %v73_v38  ;;  %vm84_vm4 = vcmp.lt.s32.totalorder %v82_v37, %v83_v39  ;;  %v103_v43 = vrot.slane %v102_v42, 1 }
  0x22   :  { %v85_v44 = vsel %vm84_vm4, %v82_v37, %v83_v39  ;;  %vm94_vm6 = vcmp.lt.s32.totalorder %v92_v40, %v93_v41  ;;  %v75_v47 = vsel %vm74_vm3, %v72_v36, %v73_v38 }
  0x23   :  { %v106_v46 = vrot.slane %v85_v44, 7  ;;  %vm104_vm7 = vcmp.lt.s32.totalorder %v102_v42, %v103_v43  ;;  %v95_v52 = vsel %vm94_vm6, %v92_v40, %v93_v41 }
  0x24   :  { %v105_v48 = vsel %vm104_vm7, %v102_v42, %v103_v43 }
  0x25   :  { %v109_v49 = vsel %vm108_vm5, %v75_v47, %v106_v46  ;;  %v107_v51 = vrot.slane %v105_v48, 7 }
  0x26   :  { %vm111_vm8 = vcmp.lt.s32.totalorder %v63_v45, %v109_v49 }
  0x27   :  { %v112_v53 = vsel %vm111_vm8, %v63_v45, %v109_v49  ;;  %v110_v54 = vsel %vm108_vm5, %v95_v52, %v107_v51 }
  0x28   :  { %119 = vst.msk [vmem:[#allocation2] sm:$0x3] %vm215_vm0, %v112_v53  ;;  %vm113_vm9 = vcmp.lt.s32.totalorder %v64_v50, %v110_v54 }
  0x29   :  { %v114_v55 = vsel %vm113_vm9, %v64_v50, %v110_v54 }
  0x2a   :  { %120 = vst.msk [vmem:[#allocation2 + $0x2] sm:$0x3] %vm215_vm0, %v114_v55  ;;  %vm154_vm0 = vmor %vm238_vm14, %vm234_vm13 }
  0x2f   :  { %v124_v56 = vld [vmem:[#allocation2] sm:$0x3] }
  0x30   :  { %v126_v57 = vperm.slane %v124_v56, 0  ;;  %v127_v58 = vperm.slane %v124_v56, 1 }
  0x31   :  { %v125_v59 = vld [vmem:[#allocation2 + $0x2] sm:$0x3] }
  0x32   :  { %v130_v60 = vpack.c.b16 %v126_v57, %v126_v57  ;;  %v132_v61 = vpack.c.b16 %v127_v58, %v127_v58  ;;  %v128_v63 = vperm.slane %v125_v59, 0  ;;  %v129_v0 = vperm.slane %v125_v59, 1 }
  0x34   :  { %v133_v1 = vpack.c.b8 %v132_v61, %v132_v61  ;;  %v134_v3 = vpack.c.b16 %v128_v63, %v128_v63  ;;  %v136_v4 = vpack.c.b16 %v129_v0, %v129_v0  ;;  %v131_v5 = vpack.c.b8 %v130_v60, %v130_v60 }
  0x36   :  { %v138_v6 = vrot.slane %v133_v1, 7  ;;  %v137_v8 = vpack.c.b8 %v136_v4, %v136_v4  ;;  %v135_v10 = vpack.c.b8 %v134_v3, %v134_v3 }
  0x38   :  { %v142_v9 = vsel %vm108_vm5, %v131_v5, %v138_v6  ;;  %v139_v11 = vrot.slane %v137_v8, 7 }
  0x39   :  { %v156_v13 = vsel %vm154_vm0, %v142_v9, %v155_v7 }
  0x3a   :  { %157 = vst [vmem:[%s261_s1] sm:$0x3] %v156_v13  ;;  %v146_v14 = vsel %vm108_vm5, %v135_v10, %v139_v11 }
  0x3b   :  { %v159_v15 = vsel %vm154_vm0, %v146_v14, %v158_v12 }
  0x3c   :  { %160 = vst [vmem:[%s261_s1 + $0x2] sm:$0x3] %v159_v15 }
  0x3d   :  { %165 = vsyncpa [#allocation4], 1 }

</bundles_post_ra>
